<compile_context>
chip_gen: v7x
topology: tpu7x:2x2x1
jax: 0.10.0
libtpu: 0.0.40
codegen_flags: <defaults>
</compile_context>

<pallas_src>
import jax
import jax.numpy as jnp
from jax.experimental import pallas as pl
from jax.experimental.pallas import tpu as pltpu


def _round_up(x, m):
    return ((x + m - 1) // m) * m


def _vmem_budget_bytes():
    """VMEM we are willing to request: ~80% of physical, capped at 110 MiB.
    v5e/v6e (128 MiB) -> ~102 MiB; v7x (64 MiB per TensorCore) -> ~51 MiB."""
    cap = 64 << 20  # conservative default if the query is unavailable
    try:
        cap = int(getattr(pltpu.get_tpu_info(), "vmem_capacity_bytes", cap))
    except Exception:
        pass
    return int(min(cap * 4 // 5, 110 << 20))


def _ffn_kernel(x_ref, w1_ref, b1_ref, w2_ref, b2_ref, o_ref):
    # x_ref : [TM, De]      w1_ref: [De, Dh]   b1_ref: [1, Dh]
    # w2_ref: [Dh, De]      b2_ref: [1, De]    o_ref : [TM, De]
    x = x_ref[...]
    # Linear1 + bias + ReLU (MXU matmul with f32 accumulation; bias/ReLU in f32).
    h = jnp.dot(x, w1_ref[...], preferred_element_type=jnp.float32)
    h = jnp.maximum(h + b1_ref[...].astype(jnp.float32), 0.0)
    # TODO(synk): dropout is identity at inference; a training-mode kernel would
    #             mask here with pltpu.prng_seed / pltpu.prng_random_bits.
    # Linear2 (downcast only the matmul operand; elementwise stays f32).
    y = jnp.dot(h.astype(w2_ref.dtype), w2_ref[...],
                preferred_element_type=jnp.float32)
    o_ref[...] = (y + b2_ref[...].astype(jnp.float32)).astype(o_ref.dtype)


def positionwise_feed_forward(x, w1, b1, w2, b2, *, tm=None, mxu_dtype=None):
    """y = Linear2(ReLU(Linear1(x)));  x: [B, S, d_emb] -> [B, S, d_emb].

    tm:        optional token-tile rows (auto-derived from VMEM if None).
    mxu_dtype: optional matmul dtype (e.g. jnp.bfloat16) for the fast MXU path;
               accumulation/bias/output remain f32-exact w.r.t. that dtype.
    """
    B, S, d_emb = x.shape
    d_hidden = w1.shape[1]
    M = B * S
    out_dtype = x.dtype

    # Natural shapes only -- no pad / slice copies of activations or weights.
    x2d = x.reshape(M, d_emb)
    b1_2d = b1.reshape(1, d_hidden)
    b2_2d = b2.reshape(1, d_emb)

    if mxu_dtype is not None and jnp.dtype(mxu_dtype) != jnp.dtype(x.dtype):
        x2d = x2d.astype(mxu_dtype)
        w1 = w1.astype(mxu_dtype)
        w2 = w2.astype(mxu_dtype)

    def run(single_buffer_weights):
        # ---------------- VMEM budget -> tile size --------------------------
        budget = _vmem_budget_bytes()
        w_item = jnp.dtype(w1.dtype).itemsize
        b_item = jnp.dtype(b1_2d.dtype).itemsize
        x_item = jnp.dtype(x2d.dtype).itemsize
        o_item = jnp.dtype(out_dtype).itemsize
        nbuf_w = 1 if single_buffer_weights else 2
        resident = nbuf_w * (2 * d_emb * d_hidden * w_item
                             + (d_hidden + d_emb) * b_item)
        per_row = (2 * d_emb * x_item           # double-buffered input tile
                   + 2 * d_emb * o_item         # double-buffered output tile
                   + 4 * d_hidden + 4 * d_emb)  # f32 intermediates (h, y)

        if tm is None:
            avail = budget - resident - (4 << 20)   # misc/scratch headroom
            if avail >= 8 * per_row:
                tile = min(1024, (avail // per_row) // 8 * 8)
            else:
                # TODO(synk): resident weights overflow the VMEM budget (very
                # large d_hidden on v7x) -- a Dh-blocked grid axis with an f32
                # (TM, d_emb) accumulator would be needed; use a small tile.
                tile = 256
        else:
            tile = int(tm)
        tile = max(8, _round_up(tile, 8))

        if tile >= M:
            TM = M                      # single full-extent block (always legal)
        else:
            TM = tile                   # multiple of 8; partial last tile masked
        grid_m = pl.cdiv(M, TM)

        # Prefer an even grid so v7x's two TensorCores split the parallel axis.
        if TM < M and grid_m > 1 and grid_m % 2 == 1:
            tm_even = _round_up(pl.cdiv(M, grid_m + 1), 8)
            if 8 <= tm_even < TM and pl.cdiv(M, tm_even) % 2 == 0:
                TM, grid_m = tm_even, pl.cdiv(M, tm_even)

        def resident_spec(shape):
            if single_buffer_weights:
                # Constant index_map -> fetched once; one buffer halves weight VMEM.
                return pl.BlockSpec(shape, lambda i: (0, 0),
                                    pipeline_mode=pl.Buffered(1))
            return pl.BlockSpec(shape, lambda i: (0, 0))

        vmem_needed = resident + TM * per_row + (4 << 20)
        vmem_limit = int(min(budget, max(vmem_needed, 32 << 20)))

        cost = pl.CostEstimate(
            flops=4 * M * d_emb * d_hidden,  # two matmuls
            transcendentals=0,
            bytes_accessed=(M * d_emb * (x_item + o_item)
                            + 2 * d_emb * d_hidden * w_item
                            + (d_hidden + d_emb) * b_item),
        )

        return pl.pallas_call(
            _ffn_kernel,
            out_shape=jax.ShapeDtypeStruct((M, d_emb), out_dtype),
            grid_spec=pltpu.PrefetchScalarGridSpec(
                num_scalar_prefetch=0,
                grid=(grid_m,),
                in_specs=[
                    pl.BlockSpec((TM, d_emb), lambda i: (i, 0)),  # streamed x
                    resident_spec((d_emb, d_hidden)),             # resident w1
                    resident_spec((1, d_hidden)),                 # resident b1
                    resident_spec((d_hidden, d_emb)),             # resident w2
                    resident_spec((1, d_emb)),                    # resident b2
                ],
                out_specs=pl.BlockSpec((TM, d_emb), lambda i: (i, 0)),
            ),
            compiler_params=pltpu.CompilerParams(
                dimension_semantics=("parallel",),   # token axis -> megacore
                vmem_limit_bytes=vmem_limit,
            ),
            cost_estimate=cost,
        )(x2d, w1, b1_2d, w2, b2_2d)

    try:
        out = run(single_buffer_weights=True)
    except Exception:
        # pipeline_mode=pl.Buffered(1) unsupported on this jax/libtpu: fall back
        # to default double-buffered resident weights (correct, more VMEM).
        out = run(single_buffer_weights=False)

    return out.reshape(B, S, d_emb)


if __name__ == "__main__":
    # config: d_emb=32, d_hidden=64, dropout=0.1 (identity at inference)
    B, S, d_emb, d_hidden = 2, 8, 32, 64

    key = jax.random.PRNGKey(0)
    kx, kw1, kb1, kw2, kb2, kx2, kw12, kb12, kw22, kb22 = jax.random.split(key, 10)

    # Deterministic PyTorch-style init: U(-1/sqrt(fan_in), 1/sqrt(fan_in))
    lim1 = 1.0 / (d_emb ** 0.5)
    lim2 = 1.0 / (d_hidden ** 0.5)
    w1 = jax.random.uniform(kw1, (d_emb, d_hidden), jnp.float32, -lim1, lim1)
    b1 = jax.random.uniform(kb1, (d_hidden,), jnp.float32, -lim1, lim1)
    w2 = jax.random.uniform(kw2, (d_hidden, d_emb), jnp.float32, -lim2, lim2)
    b2 = jax.random.uniform(kb2, (d_emb,), jnp.float32, -lim2, lim2)
    x = jax.random.normal(kx, (B, S, d_emb), jnp.float32)

    ref = jnp.maximum(x @ w1 + b1, 0.0) @ w2 + b2

    # 1) default (auto TM, single grid step), exact f32 semantics
    y = jax.block_until_ready(positionwise_feed_forward(x, w1, b1, w2, b2))
    assert y.shape == (B, S, d_emb)
    assert jnp.allclose(y, ref, atol=1e-5, rtol=1e-5)

    # 2) forced multi-step streaming over the token axis (grid_m = 2)
    y2 = jax.block_until_ready(positionwise_feed_forward(x, w1, b1, w2, b2, tm=8))
    assert jnp.allclose(y2, ref, atol=1e-5, rtol=1e-5)

    # 3) ragged token count + non-128 features -> partial (masked) last tile
    Br, Sr, der, dhr = 3, 5, 48, 96
    lim1r, lim2r = 1.0 / (der ** 0.5), 1.0 / (dhr ** 0.5)
    w1r = jax.random.uniform(kw12, (der, dhr), jnp.float32, -lim1r, lim1r)
    b1r = jax.random.uniform(kb12, (dhr,), jnp.float32, -lim1r, lim1r)
    w2r = jax.random.uniform(kw22, (dhr, der), jnp.float32, -lim2r, lim2r)
    b2r = jax.random.uniform(kb22, (der,), jnp.float32, -lim2r, lim2r)
    xr = jax.random.normal(kx2, (Br, Sr, der), jnp.float32)
    yr = jax.block_until_ready(
        positionwise_feed_forward(xr, w1r, b1r, w2r, b2r, tm=8))
    refr = jnp.maximum(xr @ w1r + b1r, 0.0) @ w2r + b2r
    assert jnp.allclose(yr, refr, atol=1e-5, rtol=1e-5)

    # 4) bf16 MXU fast path (f32 accumulation) -- looser tolerance
    yb = jax.block_until_ready(
        positionwise_feed_forward(x, w1, b1, w2, b2, mxu_dtype=jnp.bfloat16))
    assert jnp.allclose(yb, ref, atol=5e-2, rtol=5e-2)

    print("KERNEL_OK")
</pallas_src>

<mosaic_0001>
module attributes {stable_mosaic.version = 11 : i64} {
  func.func @_ffn_kernel(%arg0: i32, %arg1: memref<16x32xf32, #tpu.memory_space<vmem>>, %arg2: memref<32x64xf32, #tpu.memory_space<vmem>>, %arg3: memref<1x64xf32, #tpu.memory_space<vmem>>, %arg4: memref<64x32xf32, #tpu.memory_space<vmem>>, %arg5: memref<1x32xf32, #tpu.memory_space<vmem>>, %arg6: memref<16x32xf32, #tpu.memory_space<vmem>>) attributes {dimension_semantics = [#tpu.dimension_semantics<parallel>], iteration_bounds = array<i64: 1>, scalar_prefetch = 0 : i64, scratch_operands = 0 : i64, tpu.core_type = #tpu.core_type<tc>, window_params = [{transform_indices = @transform_0, window_bounds = array<i64: 16, 32>}, {pipeline_mode = #tpu.pipeline_mode<synchronous>, transform_indices = @transform_1, window_bounds = array<i64: 32, 64>}, {pipeline_mode = #tpu.pipeline_mode<synchronous>, transform_indices = @transform_2, window_bounds = array<i64: 1, 64>}, {pipeline_mode = #tpu.pipeline_mode<synchronous>, transform_indices = @transform_3, window_bounds = array<i64: 64, 32>}, {pipeline_mode = #tpu.pipeline_mode<synchronous>, transform_indices = @transform_4, window_bounds = array<i64: 1, 32>}, {transform_indices = @transform_5, window_bounds = array<i64: 16, 32>}]} {
    %c0 = arith.constant 0 : index
    %c0_0 = arith.constant 0 : index
    %0 = vector.load %arg1[%c0, %c0_0] : memref<16x32xf32, #tpu.memory_space<vmem>>, vector<16x32xf32>
    %c0_1 = arith.constant 0 : index
    %c0_2 = arith.constant 0 : index
    %1 = vector.load %arg2[%c0_1, %c0_2] : memref<32x64xf32, #tpu.memory_space<vmem>>, vector<32x64xf32>
    %cst = arith.constant dense<0.000000e+00> : vector<16x64xf32>
    %2 = tpu.matmul %0, %1, %cst {dimension_numbers = #tpu.dot_dimension_numbers<[1], [0], [0], [1], [0, 0, 1, 1], [], []>} : vector<16x32xf32>, vector<32x64xf32>, vector<16x64xf32> -> vector<16x64xf32>
    %c0_3 = arith.constant 0 : index
    %c0_4 = arith.constant 0 : index
    %3 = vector.load %arg3[%c0_3, %c0_4] : memref<1x64xf32, #tpu.memory_space<vmem>>, vector<1x64xf32>
    %4 = vector.broadcast %3 : vector<1x64xf32> to vector<16x64xf32>
    %5 = arith.addf %2, %4 : vector<16x64xf32>
    %cst_5 = arith.constant 0.000000e+00 : f32
    %6 = vector.broadcast %cst_5 : f32 to vector<16x64xf32>
    %7 = arith.maximumf %5, %6 : vector<16x64xf32>
    %c0_6 = arith.constant 0 : index
    %c0_7 = arith.constant 0 : index
    %8 = vector.load %arg4[%c0_6, %c0_7] : memref<64x32xf32, #tpu.memory_space<vmem>>, vector<64x32xf32>
    %cst_8 = arith.constant dense<0.000000e+00> : vector<16x32xf32>
    %9 = tpu.matmul %7, %8, %cst_8 {dimension_numbers = #tpu.dot_dimension_numbers<[1], [0], [0], [1], [0, 0, 1, 1], [], []>} : vector<16x64xf32>, vector<64x32xf32>, vector<16x32xf32> -> vector<16x32xf32>
    %c0_9 = arith.constant 0 : index
    %c0_10 = arith.constant 0 : index
    %10 = vector.load %arg5[%c0_9, %c0_10] : memref<1x32xf32, #tpu.memory_space<vmem>>, vector<1x32xf32>
    %11 = vector.broadcast %10 : vector<1x32xf32> to vector<16x32xf32>
    %12 = arith.addf %9, %11 : vector<16x32xf32>
    %c0_11 = arith.constant 0 : index
    %c0_12 = arith.constant 0 : index
    %13 = vector.load %arg6[%c0_11, %c0_12] : memref<16x32xf32, #tpu.memory_space<vmem>>, vector<16x32xf32>
    tpu.vector_store %arg6[%c0_11, %c0_12], %12 {strides = array<i32>} : memref<16x32xf32, #tpu.memory_space<vmem>>, vector<16x32xf32>,
    return
  }
  func.func @transform_0(%arg0: i32) -> (i32, i32) {
    %c0_i32 = arith.constant 0 : i32
    %c0_i32_0 = arith.constant 0 : i32
    return %arg0, %c0_i32 : i32, i32
  }
  func.func @transform_1(%arg0: i32) -> (i32, i32) {
    %c0_i32 = arith.constant 0 : i32
    %c0_i32_0 = arith.constant 0 : i32
    %c0_i32_1 = arith.constant 0 : i32
    return %c0_i32, %c0_i32_0 : i32, i32
  }
  func.func @transform_2(%arg0: i32) -> (i32, i32) {
    %c0_i32 = arith.constant 0 : i32
    %c0_i32_0 = arith.constant 0 : i32
    %c0_i32_1 = arith.constant 0 : i32
    return %c0_i32, %c0_i32_0 : i32, i32
  }
  func.func @transform_3(%arg0: i32) -> (i32, i32) {
    %c0_i32 = arith.constant 0 : i32
    %c0_i32_0 = arith.constant 0 : i32
    %c0_i32_1 = arith.constant 0 : i32
    return %c0_i32, %c0_i32_0 : i32, i32
  }
  func.func @transform_4(%arg0: i32) -> (i32, i32) {
    %c0_i32 = arith.constant 0 : i32
    %c0_i32_0 = arith.constant 0 : i32
    %c0_i32_1 = arith.constant 0 : i32
    return %c0_i32, %c0_i32_0 : i32, i32
  }
  func.func @transform_5(%arg0: i32) -> (i32, i32) {
    %c0_i32 = arith.constant 0 : i32
    %c0_i32_0 = arith.constant 0 : i32
    return %arg0, %c0_i32 : i32, i32
  }
}

module attributes {stable_mosaic.version = 11 : i64} {
  func.func @_ffn_kernel(%arg0: i32, %arg1: memref<16x32xf32, #tpu.memory_space<vmem>>, %arg2: memref<32x64xf32, #tpu.memory_space<vmem>>, %arg3: memref<1x64xf32, #tpu.memory_space<vmem>>, %arg4: memref<64x32xf32, #tpu.memory_space<vmem>>, %arg5: memref<1x32xf32, #tpu.memory_space<vmem>>, %arg6: memref<16x32xf32, #tpu.memory_space<vmem>>) attributes {dimension_semantics = [#tpu.dimension_semantics<parallel>], iteration_bounds = array<i64: 1>, scalar_prefetch = 0 : i64, scratch_operands = 0 : i64, tpu.core_type = #tpu.core_type<tc>, window_params = [{transform_indices = @transform_0, window_bounds = array<i64: 16, 32>}, {pipeline_mode = #tpu.pipeline_mode<synchronous>, transform_indices = @transform_1, window_bounds = array<i64: 32, 64>}, {pipeline_mode = #tpu.pipeline_mode<synchronous>, transform_indices = @transform_2, window_bounds = array<i64: 1, 64>}, {pipeline_mode = #tpu.pipeline_mode<synchronous>, transform_indices = @transform_3, window_bounds = array<i64: 64, 32>}, {pipeline_mode = #tpu.pipeline_mode<synchronous>, transform_indices = @transform_4, window_bounds = array<i64: 1, 32>}, {transform_indices = @transform_5, window_bounds = array<i64: 16, 32>}]} {
    %c0 = arith.constant 0 : index
    %c0_0 = arith.constant 0 : index
    %0 = vector.load %arg1[%c0, %c0_0] : memref<16x32xf32, #tpu.memory_space<vmem>>, vector<16x32xf32>
    %c0_1 = arith.constant 0 : index
    %c0_2 = arith.constant 0 : index
    %1 = vector.load %arg2[%c0_1, %c0_2] : memref<32x64xf32, #tpu.memory_space<vmem>>, vector<32x64xf32>
    %cst = arith.constant dense<0.000000e+00> : vector<16x64xf32>
    %2 = tpu.matmul %0, %1, %cst {dimension_numbers = #tpu.dot_dimension_numbers<[1], [0], [0], [1], [0, 0, 1, 1], [], []>} : vector<16x32xf32>, vector<32x64xf32>, vector<16x64xf32> -> vector<16x64xf32>
    %c0_3 = arith.constant 0 : index
    %c0_4 = arith.constant 0 : index
    %3 = vector.load %arg3[%c0_3, %c0_4] : memref<1x64xf32, #tpu.memory_space<vmem>>, vector<1x64xf32>
    %4 = vector.broadcast %3 : vector<1x64xf32> to vector<16x64xf32>
    %5 = arith.addf %2, %4 : vector<16x64xf32>
    %cst_5 = arith.constant 0.000000e+00 : f32
    %6 = vector.broadcast %cst_5 : f32 to vector<16x64xf32>
    %7 = arith.maximumf %5, %6 : vector<16x64xf32>
    %c0_6 = arith.constant 0 : index
    %c0_7 = arith.constant 0 : index
    %8 = vector.load %arg4[%c0_6, %c0_7] : memref<64x32xf32, #tpu.memory_space<vmem>>, vector<64x32xf32>
    %cst_8 = arith.constant dense<0.000000e+00> : vector<16x32xf32>
    %9 = tpu.matmul %7, %8, %cst_8 {dimension_numbers = #tpu.dot_dimension_numbers<[1], [0], [0], [1], [0, 0, 1, 1], [], []>} : vector<16x64xf32>, vector<64x32xf32>, vector<16x32xf32> -> vector<16x32xf32>
    %c0_9 = arith.constant 0 : index
    %c0_10 = arith.constant 0 : index
    %10 = vector.load %arg5[%c0_9, %c0_10] : memref<1x32xf32, #tpu.memory_space<vmem>>, vector<1x32xf32>
    %11 = vector.broadcast %10 : vector<1x32xf32> to vector<16x32xf32>
    %12 = arith.addf %9, %11 : vector<16x32xf32>
    %c0_11 = arith.constant 0 : index
    %c0_12 = arith.constant 0 : index
    %13 = vector.load %arg6[%c0_11, %c0_12] : memref<16x32xf32, #tpu.memory_space<vmem>>, vector<16x32xf32>
    tpu.vector_store %arg6[%c0_11, %c0_12], %12 {strides = array<i32>} : memref<16x32xf32, #tpu.memory_space<vmem>>, vector<16x32xf32>,
    return
  }
  func.func @transform_0(%arg0: i32) -> (i32, i32) {
    %c0_i32 = arith.constant 0 : i32
    %c0_i32_0 = arith.constant 0 : i32
    return %arg0, %c0_i32 : i32, i32
  }
  func.func @transform_1(%arg0: i32) -> (i32, i32) {
    %c0_i32 = arith.constant 0 : i32
    %c0_i32_0 = arith.constant 0 : i32
    %c0_i32_1 = arith.constant 0 : i32
    return %c0_i32, %c0_i32_0 : i32, i32
  }
  func.func @transform_2(%arg0: i32) -> (i32, i32) {
    %c0_i32 = arith.constant 0 : i32
    %c0_i32_0 = arith.constant 0 : i32
    %c0_i32_1 = arith.constant 0 : i32
    return %c0_i32, %c0_i32_0 : i32, i32
  }
  func.func @transform_3(%arg0: i32) -> (i32, i32) {
    %c0_i32 = arith.constant 0 : i32
    %c0_i32_0 = arith.constant 0 : i32
    %c0_i32_1 = arith.constant 0 : i32
    return %c0_i32, %c0_i32_0 : i32, i32
  }
  func.func @transform_4(%arg0: i32) -> (i32, i32) {
    %c0_i32 = arith.constant 0 : i32
    %c0_i32_0 = arith.constant 0 : i32
    %c0_i32_1 = arith.constant 0 : i32
    return %c0_i32, %c0_i32_0 : i32, i32
  }
  func.func @transform_5(%arg0: i32) -> (i32, i32) {
    %c0_i32 = arith.constant 0 : i32
    %c0_i32_0 = arith.constant 0 : i32
    return %arg0, %c0_i32 : i32, i32
  }
}

</mosaic_0001>

<bundles_post_ra>
// kernel: tpu_custom_call.1
= control target key start
LH: loop header
LB: loop body
LE: loop exit
PB: predicated region body
PF: predicated region fallthrough
CT: control target
= control target key end

     0   :  { %vm34_vm0 = vcmask 261120   ;;  %s433_s0 = inlined_call_operand.vmem [shape: f32[16,32], index: 0, kind: input, shape index: {}]   ;;  %s434_s1 = inlined_call_operand.vmem [shape: f32[32,64], index: 1, kind: input, shape index: {}]   ;;  %s435_s2 = inlined_call_operand.vmem [shape: f32[1,64], index: 2, kind: input, shape index: {}]   ;;  %s436_s3 = inlined_call_operand.vmem [shape: f32[64,32], index: 3, kind: input, shape index: {}]   ;;  %s437_s4 = inlined_call_operand.vmem [shape: f32[1,32], index: 4, kind: input, shape index: {}]   ;;  %s438_s5 = inlined_call_operand.hbm [shape: f32[16,32], index: 5, kind: output, shape index: {}]  }
   0x1   :  { %v23_v0 = vld [vmem:[%s434_s1] sm:$0xff]  ;;  %v24_v1 = vld [vmem:[%s434_s1 + $0x8] sm:$0xff]  ;;  %v25_v2 = vld [vmem:[%s434_s1 + $0x10] sm:$0xff] }
   0x2   :  { %v285_v3 = vpack.c.bf16 %v24_v1, %v23_v0  ;;  %v26_v4 = vld [vmem:[%s434_s1 + $0x18] sm:$0xff]  ;;  %v21_v5 = vld [vmem:[%s433_s0] sm:$0xff]  ;;  %v119_v8 = vld [vmem:[%s436_s3 + $0x8] sm:$0xff] }
   0x3   :  { %v289_v6 = vpack.c.bf16 %v26_v4, %v25_v2  ;;  %263 = vmatprep.mubr.msk.f32.mxu0 %vm34_vm0, %v21_v5  ;;  %v118_v7 = vld [vmem:[%s436_s3] sm:$0xff]  ;;  %v120_v9 = vld [vmem:[%s436_s3 + $0x10] sm:$0xff]  ;;  %v121_v11 = vld [vmem:[%s436_s3 + $0x18] sm:$0xff] }
   0x4   :  { %286 = vmatprep.subr.bf16.mxu0 %v285_v3  ;;  %v293_v10 = vpack.c.bf16 %v119_v8, %v118_v7  ;;  %v297_v12 = vpack.c.bf16 %v121_v11, %v120_v9  ;;  %v122_v13 = vld [vmem:[%s436_s3 + $0x20] sm:$0xff]  ;;  %v123_v14 = vld [vmem:[%s436_s3 + $0x28] sm:$0xff] }
   0x5   :  { %288 = vmatpush3.bf16.msra.mxu0 %v285_v3 }
   0x6   :  { %10 = vsyncpa [#allocation3], 0  ;;  %290 = vmatprep.subr.bf16.mxu0 %v289_v6  ;;  %294 = vmatprep.subr.bf16.mxu1 %v293_v10  ;;  %v301_v15 = vpack.c.bf16 %v123_v14, %v122_v13  ;;  %v22_v16 = vld [vmem:[%s433_s0 + $0x8] sm:$0xff]  ;;  %v124_v17 = vld [vmem:[%s436_s3 + $0x30] sm:$0xff]  ;;  %vm133_vm1 = vcmask 523264  }
   0x7   :  { %296 = vmatpush3.bf16.msra.mxu1 %v293_v10  ;;  %v125_v18 = vld [vmem:[%s436_s3 + $0x38] sm:$0xff]  ;;  %v233_v20 = vld [vmem:[%s435_s2] ss:$0 sm:$0xff]  ;;  %s336_s3 = smov [#allocation2]  }
   0x8   :  { %298 = vmatprep.subr.bf16.mxu1 %v297_v12  ;;  %v305_v19 = vpack.c.bf16 %v125_v18, %v124_v17  ;;  %v236_v27 = vld [vmem:[%s437_s4] ss:$0 sm:$0xff]  ;;  %s222_s23 = sshll.u32 %s336_s3, 4  ;;  %s223_s23 = int_to_ptr.vmem [resolvable:$true] %s222_s23 }
   0x9   :  { %292 = vmatpush3.bf16.msra.mxu0 %v289_v6  ;;  %s312_s2 = scalar_lea.vmem %s223_s23, 256  ;;  %p317_p1 = scmp.lt.s32.totalorder %s223_s23, %s223_s23 }
   0xa   :  { %p313_p0 = scmp.ne.s32.totalorder %s223_s23, %s312_s2  ;;  %p318_p2 = scmp.lt.s32.totalorder %s312_s2, %s312_s2 }
   0xb   :  { %300 = vmatpush3.bf16.msra.mxu1 %v297_v12 }
   0xc   :  { %264 = vmatmul.mubr.msk.f32.vlgmr.msra.gmra.mrb[0].mxu0 %vm34_vm0, %v22_v16  ;;  %302 = vmatprep.subr.bf16.mxu1 %v301_v15  ;;  %p319_p3 = por %p318_p2, %p317_p1 }
   0xe   :  { %p320_p4 = pnand %p319_p3, %p313_p0 }
   0xf   :  { %304 = vmatpush3.bf16.msra.mxu1 %v301_v15 }
  0x10   :  { %306 = vmatprep.subr.bf16.mxu1 %v305_v19 }
  0x13   :  { %308 = vmatpush3.bf16.msra.mxu1 %v305_v19 }
  0xdf   :  { %v265_v21 = vpop.f32.mrb[0].mxu0 }
  0xe0   :  { %v113_v22 = vadd.f32 %v265_v21, %v233_v20  ;;  %v107_v23 = vpop.f32.mrb[1].mxu0 }
  0xe1   :  { %v108_v24 = vadd.f32 %v233_v20, %v107_v23 }
  0xe2   :  { %v117_v26 = vmax.f32 %v113_v22, 0.0 }
  0xe3   :  { %v116_v25 = vmax.f32 %v108_v24, 0.0 }
  0xe5   :  { %282 = vmatprep.mubr.msk.f32.mxu1 %vm133_vm1, %v116_v25 }
  0xe6   :  { %283 = vmatmul.mubr.msk.f32.vlgmr.msra.gmra.mrb[0].mxu1 %vm133_vm1, %v117_v26 }
 0x1b9   :  { %v284_v28 = vpop.f32.mrb[0].mxu1 }
 0x1ba   :  { %v212_v29 = vadd.f32 %v284_v28, %v236_v27  ;;  %v206_v30 = vpop.f32.mrb[1].mxu1 }
 0x1bb   :  { %v207_v31 = vadd.f32 %v236_v27, %v206_v30 }
 0x1bc   :  { %216 = vst.msk [vmem:[#allocation2 + $0x8] sm:$0xff] %vm34_vm0, %v212_v29 }
 0x1bd   :  { %215 = vst.msk [vmem:[#allocation2] sm:$0xff] %vm34_vm0, %v207_v31 }
 0x1be   :  { %323 = shalt.err (!%p320_p4)
}
 0x1bf   :  { %s324_s25 = scalar_lea.hbm %s438_s5, 256 }
 0x1c0   :  { %p325_p5 = scmp.ne.s32.totalorder %s438_s5, %s324_s25  ;;  %p328_p6 = scmp.lt.u32.totalorder %s324_s25, %s438_s5 }
 0x1c2   :  { %p330_p7 = pnand %p328_p6, %p325_p5 }
 0x1c4   :  { %333 = shalt.err (!%p330_p7)
}
 0x1c5   :  { %s337_s30 = smov 128   ;;  %s338_s6 = smov 8  }
 0x1c6   :  { %228 = dma.vmem_to_hbm [thread:$0]  %s223_s23, 256, %s438_s5, [#allocation3], %s337_s30, %s337_s30, %s338_s6  }
 0x1c7   :  { %334 = dma.done.wait [#allocation3], 256  }
 0x1c8   :  { %335 = vsyncadd [#allocation3], 4294967040 }
 0x1c9   :  { %232 = vsyncpa [#allocation3], 1 }

// kernel: tpu_custom_call.1
= control target key start
LH: loop header
LB: loop body
LE: loop exit
PB: predicated region body
PF: predicated region fallthrough
CT: control target
= control target key end

     0   :  { %vm34_vm0 = vcmask 261120   ;;  %s433_s0 = inlined_call_operand.vmem [shape: f32[16,32], index: 0, kind: input, shape index: {}]   ;;  %s434_s1 = inlined_call_operand.vmem [shape: f32[32,64], index: 1, kind: input, shape index: {}]   ;;  %s435_s2 = inlined_call_operand.vmem [shape: f32[1,64], index: 2, kind: input, shape index: {}]   ;;  %s436_s3 = inlined_call_operand.vmem [shape: f32[64,32], index: 3, kind: input, shape index: {}]   ;;  %s437_s4 = inlined_call_operand.vmem [shape: f32[1,32], index: 4, kind: input, shape index: {}]   ;;  %s438_s5 = inlined_call_operand.hbm [shape: f32[16,32], index: 5, kind: output, shape index: {}]  }
   0x1   :  { %v23_v0 = vld [vmem:[%s434_s1] sm:$0xff]  ;;  %v24_v1 = vld [vmem:[%s434_s1 + $0x8] sm:$0xff]  ;;  %v25_v2 = vld [vmem:[%s434_s1 + $0x10] sm:$0xff] }
   0x2   :  { %v285_v3 = vpack.c.bf16 %v24_v1, %v23_v0  ;;  %v26_v4 = vld [vmem:[%s434_s1 + $0x18] sm:$0xff]  ;;  %v21_v5 = vld [vmem:[%s433_s0] sm:$0xff]  ;;  %v119_v8 = vld [vmem:[%s436_s3 + $0x8] sm:$0xff] }
   0x3   :  { %v289_v6 = vpack.c.bf16 %v26_v4, %v25_v2  ;;  %263 = vmatprep.mubr.msk.f32.mxu0 %vm34_vm0, %v21_v5  ;;  %v118_v7 = vld [vmem:[%s436_s3] sm:$0xff]  ;;  %v120_v9 = vld [vmem:[%s436_s3 + $0x10] sm:$0xff]  ;;  %v121_v11 = vld [vmem:[%s436_s3 + $0x18] sm:$0xff] }
   0x4   :  { %286 = vmatprep.subr.bf16.mxu0 %v285_v3  ;;  %v293_v10 = vpack.c.bf16 %v119_v8, %v118_v7  ;;  %v297_v12 = vpack.c.bf16 %v121_v11, %v120_v9  ;;  %v122_v13 = vld [vmem:[%s436_s3 + $0x20] sm:$0xff]  ;;  %v123_v14 = vld [vmem:[%s436_s3 + $0x28] sm:$0xff] }
   0x5   :  { %288 = vmatpush3.bf16.msra.mxu0 %v285_v3 }
   0x6   :  { %10 = vsyncpa [#allocation3], 0  ;;  %290 = vmatprep.subr.bf16.mxu0 %v289_v6  ;;  %294 = vmatprep.subr.bf16.mxu1 %v293_v10  ;;  %v301_v15 = vpack.c.bf16 %v123_v14, %v122_v13  ;;  %v22_v16 = vld [vmem:[%s433_s0 + $0x8] sm:$0xff]  ;;  %v124_v17 = vld [vmem:[%s436_s3 + $0x30] sm:$0xff]  ;;  %vm133_vm1 = vcmask 523264  }
   0x7   :  { %296 = vmatpush3.bf16.msra.mxu1 %v293_v10  ;;  %v125_v18 = vld [vmem:[%s436_s3 + $0x38] sm:$0xff]  ;;  %v233_v20 = vld [vmem:[%s435_s2] ss:$0 sm:$0xff]  ;;  %s336_s3 = smov [#allocation2]  }
   0x8   :  { %298 = vmatprep.subr.bf16.mxu1 %v297_v12  ;;  %v305_v19 = vpack.c.bf16 %v125_v18, %v124_v17  ;;  %v236_v27 = vld [vmem:[%s437_s4] ss:$0 sm:$0xff]  ;;  %s222_s23 = sshll.u32 %s336_s3, 4  ;;  %s223_s23 = int_to_ptr.vmem [resolvable:$true] %s222_s23 }
   0x9   :  { %292 = vmatpush3.bf16.msra.mxu0 %v289_v6  ;;  %s312_s2 = scalar_lea.vmem %s223_s23, 256  ;;  %p317_p1 = scmp.lt.s32.totalorder %s223_s23, %s223_s23 }
   0xa   :  { %p313_p0 = scmp.ne.s32.totalorder %s223_s23, %s312_s2  ;;  %p318_p2 = scmp.lt.s32.totalorder %s312_s2, %s312_s2 }
   0xb   :  { %300 = vmatpush3.bf16.msra.mxu1 %v297_v12 }
   0xc   :  { %264 = vmatmul.mubr.msk.f32.vlgmr.msra.gmra.mrb[0].mxu0 %vm34_vm0, %v22_v16  ;;  %302 = vmatprep.subr.bf16.mxu1 %v301_v15  ;;  %p319_p3 = por %p318_p2, %p317_p1 }
   0xe   :  { %p320_p4 = pnand %p319_p3, %p313_p0 }
   0xf   :  { %304 = vmatpush3.bf16.msra.mxu1 %v301_v15 }
  0x10   :  { %306 = vmatprep.subr.bf16.mxu1 %v305_v19 }
  0x13   :  { %308 = vmatpush3.bf16.msra.mxu1 %v305_v19 }
  0xdf   :  { %v265_v21 = vpop.f32.mrb[0].mxu0 }
  0xe0   :  { %v113_v22 = vadd.f32 %v265_v21, %v233_v20  ;;  %v107_v23 = vpop.f32.mrb[1].mxu0 }
  0xe1   :  { %v108_v24 = vadd.f32 %v233_v20, %v107_v23 }
  0xe2   :  { %v117_v26 = vmax.f32 %v113_v22, 0.0 }
  0xe3   :  { %v116_v25 = vmax.f32 %v108_v24, 0.0 }
  0xe5   :  { %282 = vmatprep.mubr.msk.f32.mxu1 %vm133_vm1, %v116_v25 }
  0xe6   :  { %283 = vmatmul.mubr.msk.f32.vlgmr.msra.gmra.mrb[0].mxu1 %vm133_vm1, %v117_v26 }
 0x1b9   :  { %v284_v28 = vpop.f32.mrb[0].mxu1 }
 0x1ba   :  { %v212_v29 = vadd.f32 %v284_v28, %v236_v27  ;;  %v206_v30 = vpop.f32.mrb[1].mxu1 }
 0x1bb   :  { %v207_v31 = vadd.f32 %v236_v27, %v206_v30 }
 0x1bc   :  { %216 = vst.msk [vmem:[#allocation2 + $0x8] sm:$0xff] %vm34_vm0, %v212_v29 }
 0x1bd   :  { %215 = vst.msk [vmem:[#allocation2] sm:$0xff] %vm34_vm0, %v207_v31 }
 0x1be   :  { %323 = shalt.err (!%p320_p4)
}
 0x1bf   :  { %s324_s25 = scalar_lea.hbm %s438_s5, 256 }
 0x1c0   :  { %p325_p5 = scmp.ne.s32.totalorder %s438_s5, %s324_s25  ;;  %p328_p6 = scmp.lt.u32.totalorder %s324_s25, %s438_s5 }
 0x1c2   :  { %p330_p7 = pnand %p328_p6, %p325_p5 }
 0x1c4   :  { %333 = shalt.err (!%p330_p7)
}
 0x1c5   :  { %s337_s30 = smov 128   ;;  %s338_s6 = smov 8  }
 0x1c6   :  { %228 = dma.vmem_to_hbm [thread:$0]  %s223_s23, 256, %s438_s5, [#allocation3], %s337_s30, %s337_s30, %s338_s6  }
 0x1c7   :  { %334 = dma.done.wait [#allocation3], 256  }
 0x1c8   :  { %335 = vsyncadd [#allocation3], 4294967040 }
 0x1c9   :  { %232 = vsyncpa [#allocation3], 1 }

</bundles_post_ra>
